<compile_context>
chip_gen: v7x
topology: tpu7x:2x2x1
jax: 0.10.0
libtpu: 0.0.40
codegen_flags: <defaults>
</compile_context>

<pallas_src>
import jax
import jax.numpy as jnp
from jax.experimental import pallas as pl
from jax.experimental.pallas import tpu as pltpu


# ---------------------------------------------------------------------------
# Kernels
# ---------------------------------------------------------------------------
def _scale_bias_kernel(x_ref, w_ref, b_ref, o_ref):
    # x_ref: (tb, tn) tile; w_ref/b_ref: (1, tn) blocks broadcast over rows.
    o_ref[...] = x_ref[...] * w_ref[...] + b_ref[...]


def _scale_kernel(x_ref, w_ref, o_ref):
    o_ref[...] = x_ref[...] * w_ref[...]


# ---------------------------------------------------------------------------
# Tile selection
# ---------------------------------------------------------------------------
_MAX_TN = 4096                       # lane-tile cap (multiple of 128)
_TB_CAP = 8192                       # row-tile cap
_TARGET_TILE_BYTES = 8 * 1024 * 1024  # ~8 MiB tiles: x+out double-buffered = 32 MiB


def _sublane_multiple(dtype):
    itemsize = jnp.dtype(dtype).itemsize
    if itemsize >= 4:
        return 8      # f32
    if itemsize == 2:
        return 16     # bf16 / f16
    return 32         # int8 / fp8


def _round_up(x, m):
    return ((x + m - 1) // m) * m


def _choose_tiles(B, N, dtype, target_tile_bytes=_TARGET_TILE_BYTES):
    """Pick (tb, tn): ~8 MiB lane-dense tiles, dtype-aware sublane rows."""
    itemsize = jnp.dtype(dtype).itemsize
    sub = _sublane_multiple(dtype)

    # Lane (feature) tile.
    if N <= _MAX_TN:
        tn = N                        # full-dim block is always legal
    else:
        # Prefer a multiple of 128 that divides N so every lane block is full;
        # otherwise take the cap and let Pallas mask the ragged edge block
        # (keeps VMEM bounded for huge / non-128-multiple N).
        tn = _MAX_TN
        for cand in range(_MAX_TN, 511, -128):
            if N % cand == 0:
                tn = cand
                break

    # Row tile from the byte budget, rounded to the dtype sublane multiple.
    tb = max(sub, target_tile_bytes // max(1, tn * itemsize))
    tb = max(sub, (tb // sub) * sub)
    tb = min(tb, _TB_CAP)

    # Keep the grid fed: aim for >= 8 blocks total (2 TCs on v7x, 2-deep
    # pipeline) whenever each row block can still hold >= `sub` rows.
    n_col = pl.cdiv(N, tn)
    if n_col * pl.cdiv(B, tb) < 8:
        want_rows = pl.cdiv(8, n_col)
        tb = min(tb, max(sub, _round_up(pl.cdiv(B, want_rows), sub)))

    if tb >= B:
        tb = B                        # full-dim row block is always legal
    return tb, tn


# ---------------------------------------------------------------------------
# Public wrapper
# ---------------------------------------------------------------------------
def vector_linear(x, weight, bias=None, *, use_pallas=None,
                  min_pallas_bytes=8 * 1024 * 1024):
    """Pallas equivalent of VectorLinear.forward: x * weight (+ bias).

    x:      (B, N)
    weight: (1, N)
    bias:   (1, N) or None
    use_pallas: True/False to force the path; None = auto (size-gated).
    """
    B, N = x.shape
    assert weight.shape == (1, N)
    if bias is not None:
        assert bias.shape == (1, N)

    itemsize = jnp.dtype(x.dtype).itemsize
    if use_pallas is None:
        use_pallas = (B * N * itemsize) >= min_pallas_bytes
    if not use_pallas:
        # Below pipeline size, XLA's fused elementwise beats a pallas_call
        # dispatch (and on v7x a 1-2 step grid would idle one TensorCore).
        return x * weight + bias if bias is not None else x * weight

    tb, tn = _choose_tiles(B, N, x.dtype)
    n_row = pl.cdiv(B, tb)
    n_col = pl.cdiv(N, tn)

    # Feature axis OUTER, rows INNER: the param block index depends only on the
    # outer axis, so weight/bias stay resident in VMEM across the whole inner
    # row sweep instead of being re-DMA'd every step.
    grid = (n_col, n_row)
    x_spec = pl.BlockSpec((tb, tn), lambda j, i: (i, j))
    p_spec = pl.BlockSpec((1, tn), lambda j, i: (0, j))
    o_spec = pl.BlockSpec((tb, tn), lambda j, i: (i, j))

    n_params = 2 if bias is not None else 1
    cost = pl.CostEstimate(
        flops=n_params * B * N,                                  # mul (+ add)
        transcendentals=0,
        bytes_accessed=(2 * B * N + n_params * N) * itemsize,    # x in, out, params
    )
    compiler_params = pltpu.CompilerParams(
        dimension_semantics=("parallel", "parallel"),
        # Above v5e's 16 MiB / v6e's 32 MiB scoped defaults, below v7x's
        # 64 MiB physical VMEM: 8 MiB tiles still double-buffer everywhere.
        vmem_limit_bytes=48 * 1024 * 1024,
    )

    if bias is not None:
        kernel = _scale_bias_kernel
        in_specs = [x_spec, p_spec, p_spec]
        args = (x, weight, bias)
    else:
        kernel = _scale_kernel
        in_specs = [x_spec, p_spec]
        args = (x, weight)

    return pl.pallas_call(
        kernel,
        out_shape=jax.ShapeDtypeStruct((B, N), x.dtype),
        grid=grid,
        in_specs=in_specs,
        out_specs=o_spec,
        compiler_params=compiler_params,
        cost_estimate=cost,
    )(*args)


# ---------------------------------------------------------------------------
# Self-test
# ---------------------------------------------------------------------------
if __name__ == "__main__":
    key = jax.random.PRNGKey(0)
    kx, kw, kb, kx2, kx3, kw3, kb3 = jax.random.split(key, 7)

    # --- Small f32 case (matches the PyTorch module's (1, N) params) --------
    B, N = 16, 128
    weight = 0.01 * jax.random.normal(kw, (1, N), dtype=jnp.float32)
    bias = 0.01 * jax.random.normal(kb, (1, N), dtype=jnp.float32)
    x = jax.random.normal(kx, (B, N), dtype=jnp.float32)

    out = jax.block_until_ready(vector_linear(x, weight, bias, use_pallas=True))
    ref = x * weight + bias
    assert out.shape == (B, N)
    assert jnp.allclose(out, ref, atol=1e-6, rtol=1e-6)

    # keep_bias=False path.
    out_nb = jax.block_until_ready(vector_linear(x, weight, None, use_pallas=True))
    assert jnp.allclose(out_nb, x * weight, atol=1e-6, rtol=1e-6)

    # --- bf16 case: dtype-aware sublane tiling + non-128-multiple N ----------
    Bb, Nb = 64, 384
    xb = jax.random.normal(kx2, (Bb, Nb), dtype=jnp.bfloat16)
    wb = (0.01 * jax.random.normal(kw, (1, Nb), dtype=jnp.float32)).astype(jnp.bfloat16)
    bb = (0.01 * jax.random.normal(kb, (1, Nb), dtype=jnp.float32)).astype(jnp.bfloat16)
    out_bf = jax.block_until_ready(vector_linear(xb, wb, bb, use_pallas=True))
    ref_bf = (xb.astype(jnp.float32) * wb.astype(jnp.float32)
              + bb.astype(jnp.float32))
    assert jnp.allclose(out_bf.astype(jnp.float32), ref_bf, atol=2e-2, rtol=2e-2)

    # --- Wide-N case exercises column tiling (N=4224 -> tn=1408, 3 col blocks)
    #     and param residency across the outer (feature) grid axis. ----------
    Bw, Nw = 8, 4224
    xw = jax.random.normal(kx3, (Bw, Nw), dtype=jnp.float32)
    ww = 0.01 * jax.random.normal(kw3, (1, Nw), dtype=jnp.float32)
    bw = 0.01 * jax.random.normal(kb3, (1, Nw), dtype=jnp.float32)
    out_w = jax.block_until_ready(vector_linear(xw, ww, bw, use_pallas=True))
    assert jnp.allclose(out_w, xw * ww + bw, atol=1e-6, rtol=1e-6)

    # --- Auto-dispatch fallback (tiny input skips Pallas) --------------------
    out_small = jax.block_until_ready(vector_linear(x, weight, bias))
    assert jnp.allclose(out_small, ref, atol=1e-6, rtol=1e-6)

    print("KERNEL_OK")
</pallas_src>

<mosaic_0001>
module attributes {stable_mosaic.version = 11 : i64} {
  func.func @_scale_bias_kernel(%arg0: i32, %arg1: i32, %arg2: memref<8x128xf32, #tpu.memory_space<vmem>>, %arg3: memref<1x128xf32, #tpu.memory_space<vmem>>, %arg4: memref<1x128xf32, #tpu.memory_space<vmem>>, %arg5: memref<8x128xf32, #tpu.memory_space<vmem>>) attributes {dimension_semantics = [#tpu.dimension_semantics<parallel>, #tpu.dimension_semantics<parallel>], iteration_bounds = array<i64: 1, 2>, scalar_prefetch = 0 : i64, scratch_operands = 0 : i64, tpu.core_type = #tpu.core_type<tc>, window_params = [{transform_indices = @transform_0, window_bounds = array<i64: 8, 128>}, {transform_indices = @transform_1, window_bounds = array<i64: 1, 128>}, {transform_indices = @transform_2, window_bounds = array<i64: 1, 128>}, {transform_indices = @transform_3, window_bounds = array<i64: 8, 128>}]} {
    %c0 = arith.constant 0 : index
    %c0_0 = arith.constant 0 : index
    %0 = vector.load %arg2[%c0, %c0_0] : memref<8x128xf32, #tpu.memory_space<vmem>>, vector<8x128xf32>
    %c0_1 = arith.constant 0 : index
    %c0_2 = arith.constant 0 : index
    %1 = vector.load %arg3[%c0_1, %c0_2] : memref<1x128xf32, #tpu.memory_space<vmem>>, vector<1x128xf32>
    %2 = vector.broadcast %1 : vector<1x128xf32> to vector<8x128xf32>
    %3 = arith.mulf %0, %2 : vector<8x128xf32>
    %c0_3 = arith.constant 0 : index
    %c0_4 = arith.constant 0 : index
    %4 = vector.load %arg4[%c0_3, %c0_4] : memref<1x128xf32, #tpu.memory_space<vmem>>, vector<1x128xf32>
    %5 = vector.broadcast %4 : vector<1x128xf32> to vector<8x128xf32>
    %6 = arith.addf %3, %5 : vector<8x128xf32>
    %c0_5 = arith.constant 0 : index
    %c0_6 = arith.constant 0 : index
    %7 = vector.load %arg5[%c0_5, %c0_6] : memref<8x128xf32, #tpu.memory_space<vmem>>, vector<8x128xf32>
    tpu.vector_store %arg5[%c0_5, %c0_6], %6 {strides = array<i32>} : memref<8x128xf32, #tpu.memory_space<vmem>>, vector<8x128xf32>,
    return
  }
  func.func @transform_0(%arg0: i32, %arg1: i32) -> (i32, i32) {
    %c0_i32 = arith.constant 0 : i32
    return %arg1, %arg0 : i32, i32
  }
  func.func @transform_1(%arg0: i32, %arg1: i32) -> (i32, i32) {
    %c0_i32 = arith.constant 0 : i32
    %c0_i32_0 = arith.constant 0 : i32
    return %c0_i32, %arg0 : i32, i32
  }
  func.func @transform_2(%arg0: i32, %arg1: i32) -> (i32, i32) {
    %c0_i32 = arith.constant 0 : i32
    %c0_i32_0 = arith.constant 0 : i32
    return %c0_i32, %arg0 : i32, i32
  }
  func.func @transform_3(%arg0: i32, %arg1: i32) -> (i32, i32) {
    %c0_i32 = arith.constant 0 : i32
    return %arg1, %arg0 : i32, i32
  }
}

</mosaic_0001>

<bundles_post_ra>
// kernel: tpu_custom_call.1
= control target key start
LH: loop header
LB: loop body
LE: loop exit
PB: predicated region body
PF: predicated region fallthrough
CT: control target
= control target key end

     0   :  { %8 = vsyncpa [#allocation3], 0  ;;  %s761_s0 = inlined_call_operand.hbm [shape: f32[16,128], index: 0, kind: input, shape index: {}]   ;;  %s762_s1 = inlined_call_operand.vmem [shape: f32[1,128], index: 1, kind: input, shape index: {}]   ;;  %s763_s2 = inlined_call_operand.vmem [shape: f32[1,128], index: 2, kind: input, shape index: {}]   ;;  %s764_s3 = inlined_call_operand.hbm [shape: f32[16,128], index: 3, kind: output, shape index: {}]  }
   0x1   :  { %10 = vsyncpa [#allocation3 + $0x1], 0 }
   0x2   :  { %11 = vsyncpa [#allocation4], 0 }
   0x3   :  { %13 = vsyncpa [#allocation4 + $0x1], 0  ;;  %s583_s12 = smov 0   ;;  %s585_s13 = smov 0  }
   0x4   :  { %s587_s14 = smov 0   ;;  %s589_s15 = smov 0  }
   0x5   :  { %s591_s16 = smov 0   ;;  %s593_s17 = smov 0  }
   0x6 LB: > { %s368_s18 = sadd.s32 4294967295, %s559_s17   ;;  %s369_s19 = sadd.s32 4294967294, %s559_s17   ;;  %s559_s17 = sphi %s593_s17, %s19_s17   ;;  %s555_s16 = sphi %s591_s16, %s780_s16   ;;  %s551_s15 = sphi %s589_s15, %s779_s15   ;;  %s547_s14 = sphi %s587_s14, %s778_s14   ;;  %s543_s13 = sphi %s585_s13, %s777_s13   ;;  %s539_s12 = sphi %s583_s12, %s776_s12  }
   0x7   : > { %s28_s20 = sadd.s32 1, %s555_s16  ;;  %s40_s21 = sadd.s32 1, %s547_s14 }
   0x8   : > { %p29_p0 = scmp.ge.s32.totalorder %s28_s20, 2  ;;  %p47_p1 = scmp.ne.s32.totalorder %s547_s14, %s543_s13 }
   0x9   : > { %p48_p2 = scmp.eq.s32.totalorder %s559_s17, 0  ;;  %p53_p3 = scmp.ne.s32.totalorder %s543_s13, %s539_s12 }
   0xa   : > { %s782_s20 = smov (%p29_p0, %s28_s20), 0  ;;  %p54_p5 = scmp.eq.s32.totalorder %s368_s18, 0 }
   0xb   : > { %p624_p4 = por %p48_p2, %p47_p1  ;;  %s35_s23 = ssub.s32 %s555_s16, %s782_s20 }
   0xc   : > { %p131_p6 = scmp.eq.s32.totalorder %s368_s18, 1  ;;  %p38_p7 = scmp.eq.s32.totalorder %s35_s23, 0 }
   0xd   : > { %p630_p8 = por %p54_p5, %p53_p3  ;;  %p137_p10 = scmp.eq.s32.totalorder %s369_s19, 1 }
   0xe   : > { %p634_p9 = por %p131_p6, %p47_p1  ;;  %p397_p13 = scmp.lt.s32.totalorder %s559_s17, 2 }
   0xf   : > { %s639_s26 = scalar_select %p38_p7, %s547_s14, %s40_s21  }
  0x10   : > { %s768_s25 = scalar_select %p634_p9, 1, 0 }
  0x11   : > { %p641_p11 = por %p137_p10, %p53_p3  ;;  %s169_s28 = sand.u32 1, %s547_s14  }
  0x12   : > { %s374_s29 = sshll.u32 %s169_s28, 3  ;;  %s375_s30 = sshll.u32 %s555_s16, 7 }
  0x13   : > { %s769_s27 = scalar_select %p641_p11, 1, 0 }
  0x14   : > { %s652_s6 = scalar_lea.hbm %s761_s0, %s375_s30  ;;  %s173_s7 = scalar_lea.vmem [#allocation2], %s374_s29 }
  0x15   : > { %s181_s8 = sshll.u32 %s173_s7, 4  ;;  %p658_p0 = pnand %p397_p13, %p624_p4  ;;  %s654_s8 = int_to_ptr.vmem [resolvable:$true] %s181_s8 }
  0x16   : > { %s170_s10 = scalar_lea.sflag [#allocation3], %s169_s28  ;;  %s447_s11 = scalar_lea.hbm %s652_s6, 128 }
  0x17   : > { %p448_p3 = scmp.ne.s32.totalorder %s652_s6, %s447_s11  ;;  %p449_p5 = pneg %p658_p0 }
  0x18   : > { %s452_s21 = scalar_lea.hbm %s761_s0, 256  ;;  %p453_p4 = scmp.lt.u32.totalorder %s652_s6, %s761_s0 }
  0x19   : > { %p450_p6 = pnand %p449_p5, %p448_p3  ;;  %p454_p10 = scmp.lt.u32.totalorder %s452_s21, %s447_s11 }
  0x1a   : > { %p456_p12 = scmp.lt.u32.totalorder %s447_s11, %s652_s6 }
  0x1b   : > { %p451_p7 = pneg %p450_p6  ;;  %p455_p13 = por %p454_p10, %p453_p4 }
  0x1d   : > { %p457_p1 = por %p456_p12, %p455_p13 }
  0x1f   : > { %p458_p2 = pnand %p457_p1, %p451_p7 }
  0x21   : > { %461 = shalt.err (!%p458_p2)
}
  0x22   : > { %s462_s28 = scalar_lea.vmem %s654_s8, 128  ;;  %s561_s29 = smov [#allocation2]  }
  0x23   : > { %p463_p3 = scmp.ne.s32.totalorder %s654_s8, %s462_s28  ;;  %s467_s30 = sshll.u32 %s561_s29, 4  ;;  %s468_s30 = int_to_ptr.vmem [resolvable:$false] %s467_s30 }
  0x24   : > { %s469_s4 = scalar_lea.vmem %s468_s30, 256  ;;  %p470_p9 = scmp.lt.s32.totalorder %s654_s8, %s468_s30 }
  0x25   : > { %p465_p6 = pnand %p463_p3, %p449_p5  ;;  %p471_p4 = scmp.lt.s32.totalorder %s469_s4, %s462_s28 }
  0x27   : > { %p466_p11 = pneg %p465_p6  ;;  %p472_p10 = por %p471_p4, %p470_p9 }
  0x29   : > { %p473_p12 = pnand %p472_p10, %p466_p11 }
  0x2b   : > { %476 = shalt.err (!%p473_p12)
}
  0x2c   : > { %392 = dma.hbm_to_vmem [thread:$0]  (!%p658_p0), %s652_s6, 128, %s654_s8, %s170_s10  }
  0x2d   : > { %p771_p1 = scmp.lt.s32.totalorder %s559_s17, 3  ;;  %p772_p2 = scmp.ge.s32.totalorder %s559_s17, 1 }
  0x2f   : > { %p187_p5 = pnand %p772_p2, %p771_p1 }
  0x30   : > { %s694_s5 = sand.u32 (!%p187_p5), 1, %s543_s13  }
  0x31   : > { %190 = sbr.rel (%p187_p5) target bundleno = 83 (0x53), region = 32  ;;  %s377_s7 = sshll.u32 (!%p187_p5), %s694_s5, 3 }
  0x32   : > { %s193_s11 = scalar_lea.sflag (!%p187_p5), [#allocation3], %s694_s5  ;;  %s196_s18 = scalar_lea.vmem (!%p187_p5), [#allocation2], %s377_s7 }
  0x38   : > { %530 = dma.done.wait (%p630_p8), %s193_s11, 128  }
  0x39   : > { %532 = vsyncadd (%p630_p8), %s193_s11, 4294967168  ;;  %s224_s6 = scalar_lea.vmem [#allocation5], %s377_s7  ;;  %v231_v0 = vld [vmem:[%s196_s18] sm:$0xff]  ;;  %s382_s22 = sshll.u32 %s551_s15, 7 }
  0x3a   : > { %s264_s8 = sshll.u32 %s224_s6, 4  ;;  %v379_v1 = vld [vmem:[%s762_s1] ss:$0 sm:$0xff]  ;;  %s714_s28 = scalar_lea.hbm %s764_s3, %s382_s22  ;;  %s709_s8 = int_to_ptr.vmem [resolvable:$true] %s264_s8 }
  0x3b   : > { %v380_v2 = vld [vmem:[%s763_s2] ss:$0 sm:$0xff]  ;;  %v239_v3 = vmul.f32 %v379_v1, %v231_v0  ;;  %s250_s29 = scalar_lea.sflag [#allocation4], %s694_s5  ;;  %s477_s30 = scalar_lea.vmem %s709_s8, 128 }
  0x3c   : > { %p478_p8 = scmp.ne.s32.totalorder %s709_s8, %s477_s30  ;;  %p773_p9 = scmp.ne.s32.totalorder %s768_s25, 0 }
  0x3d   : > { %v247_v4 = vadd.f32 %v380_v2, %v239_v3  ;;  %s562_s15 = smov [#allocation5]  }
  0x3e   : > { %p479_p11 = pnand %p478_p8, %p773_p9  ;;  %s481_s4 = sshll.u32 %s562_s15, 4  ;;  %s482_s4 = int_to_ptr.vmem [resolvable:$false] %s481_s4 }
  0x3f   : > { %248 = vst [vmem:[%s224_s6] sm:$0xff] %v247_v4  ;;  %s483_s7 = scalar_lea.vmem %s482_s4, 256  ;;  %p484_p7 = scmp.lt.s32.totalorder %s709_s8, %s482_s4 }
  0x40   : > { %p480_p0 = pneg %p479_p11  ;;  %p485_p13 = scmp.lt.s32.totalorder %s483_s7, %s477_s30 }
  0x42   : > { %p486_p3 = por %p485_p13, %p484_p7 }
  0x44   : > { %p487_p6 = pnand %p486_p3, %p480_p0 }
  0x46   : > { %490 = shalt.err (!%p487_p6)
}
  0x47   : > { %s491_s5 = scalar_lea.hbm %s714_s28, 128  ;;  %s495_s6 = scalar_lea.hbm %s764_s3, 256 }
  0x48   : > { %p492_p4 = scmp.ne.s32.totalorder %s714_s28, %s491_s5  ;;  %p496_p1 = scmp.lt.u32.totalorder %s714_s28, %s764_s3 }
  0x49   : > { %p497_p2 = scmp.lt.u32.totalorder %s495_s6, %s491_s5  ;;  %p499_p8 = scmp.lt.u32.totalorder %s491_s5, %s714_s28 }
  0x4a   : > { %p493_p10 = pnand %p492_p4, %p773_p9 }
  0x4b   : > { %p498_p5 = por %p497_p2, %p496_p1 }
  0x4c   : > { %p494_p12 = pneg %p493_p10 }
  0x4d   : > { %p500_p11 = por %p499_p8, %p498_p5 }
  0x4f   : > { %p501_p0 = pnand %p500_p11, %p494_p12 }
  0x51   : > { %504 = shalt.err (!%p501_p0)
}
  0x52   : > { %387 = dma.vmem_to_hbm [thread:$0]  (%p773_p9), %s709_s8, 128, %s714_s28, %s250_s29  }
  0x53 PF: > { %s276_s19 = sand.u32 1, %s539_s12   ;;  %p774_p7 = scmp.ne.s32.totalorder %s769_s27, 0 }
  0x54   : > { %p775_p13 = scmp.ge.s32.totalorder %s559_s17, 2  ;;  %s277_s21 = scalar_lea.sflag [#allocation4], %s276_s19 }
  0x56   : > { %p394_p3 = pnand %p775_p13, %p774_p7 }
  0x58   : > { %534 = dma.done.wait (!%p394_p3), %s277_s21, 128  }
  0x59   : > { %536 = vsyncadd (!%p394_p3), %s277_s21, 4294967168  ;;  %s19_s17 = sadd.s32 1, %s559_s17   ;;  %s776_s12 = smov %s543_s13 }
  0x5a   : > { %p16_p6 = scmp.ge.s32.totalorder %s19_s17, 4   ;;  %s777_s13 = smov %s547_s14 }
  0x5b   : > { %s778_s14 = smov %s639_s26  ;;  %s779_s15 = smov %s555_s16 }
  0x5c   : > { %s780_s16 = smov %s782_s20  ;;  %18 = sbr.rel (!%p16_p6) target bundleno = 6 (0x6), region = 83 }
  0x63   :  { %282 = vsyncpa [#allocation3], 1 }
  0x64   :  { %284 = vsyncpa [#allocation3 + $0x1], 1 }
  0x65   :  { %285 = vsyncpa [#allocation4], 1 }
  0x66   :  { %287 = vsyncpa [#allocation4 + $0x1], 1 }

</bundles_post_ra>
